<compile_context>
chip_gen: v7x
topology: tpu7x:2x2x1
jax: 0.10.0
libtpu: 0.0.40
codegen_flags: <defaults>
</compile_context>

<pallas_src>
import jax
import jax.numpy as jnp
from jax.experimental import pallas as pl
from jax.experimental.pallas import tpu as pltpu


def _round_up(x, m):
    return (x + m - 1) // m * m


def _normal_eq_kernel(x_ref, y_ref, xtx_ref, xty_ref, xsum_ref, ysum_ref):
    """Accumulate X^T X, X^T Y, sum_n X, sum_n Y over the n_samples grid axis."""
    k = pl.program_id(1)

    @pl.when(k == 0)
    def _init():
        xtx_ref[...] = jnp.zeros_like(xtx_ref)
        xty_ref[...] = jnp.zeros_like(xty_ref)
        xsum_ref[...] = jnp.zeros_like(xsum_ref)
        ysum_ref[...] = jnp.zeros_like(ysum_ref)

    X = x_ref[...]                      # (Bt, tn, D)
    Y = y_ref[...]                      # (Bt, tn, O)

    # MXU: batched Gram / cross terms, f32 accumulation into the resident out blocks.
    xtx_ref[...] += jnp.einsum('bnd,bne->bde', X, X,
                               preferred_element_type=jnp.float32)
    xty_ref[...] += jnp.einsum('bnd,bno->bdo', X, Y,
                               preferred_element_type=jnp.float32)
    # XLU: bias terms (column sums over the sample axis) — replaces the ones-concat.
    xsum_ref[...] += jnp.sum(X.astype(jnp.float32), axis=1, keepdims=True)
    ysum_ref[...] += jnp.sum(Y.astype(jnp.float32), axis=1, keepdims=True)


def ridge_normal_eq_pieces(X, Y, *, tile_rows=None):
    """Pallas kernel wrapper.

    Returns per-batch (X^T X, X^T Y, sum_n X, sum_n Y) in f32; the (D+1)-sized
    ridge normal equations are assembled by the caller.
    """
    batch, n, d = X.shape
    o = Y.shape[-1]

    # ---- tile selection (safe on v5e 16MiB-scoped / v7x 64MiB-physical VMEM) ----
    n8 = _round_up(n, 8)
    if tile_rows is None:
        tn = min(n8, 512)
    else:
        tn = min(_round_up(tile_rows, 8), n8)
    budget = 8 * 1024 * 1024            # input-tile budget (double-buffered, f32)
    bpe = 4
    while 2 * tn * (d + o) * bpe > budget and tn > 8:
        tn = max(8, (tn // 2) // 8 * 8)
    n_pad = _round_up(n, tn)

    bt = 1                               # batch elements per grid step
    for cand in range(min(batch, 8), 0, -1):
        if batch % cand == 0 and 2 * cand * tn * (d + o) * bpe <= budget:
            bt = cand
            break

    # Zero-pad the sample axis; zero rows contribute nothing to any accumulator.
    if n_pad != n:
        pad = ((0, 0), (0, n_pad - n), (0, 0))
        X = jnp.pad(X, pad)
        Y = jnp.pad(Y, pad)

    grid = (batch // bt, n_pad // tn)

    out_shapes = (
        jax.ShapeDtypeStruct((batch, d, d), jnp.float32),
        jax.ShapeDtypeStruct((batch, d, o), jnp.float32),
        jax.ShapeDtypeStruct((batch, 1, d), jnp.float32),
        jax.ShapeDtypeStruct((batch, 1, o), jnp.float32),
    )

    xtx, xty, xsum, ysum = pl.pallas_call(
        _normal_eq_kernel,
        out_shape=out_shapes,
        grid=grid,
        in_specs=[
            pl.BlockSpec((bt, tn, d), lambda b, k: (b, k, 0)),
            pl.BlockSpec((bt, tn, o), lambda b, k: (b, k, 0)),
        ],
        out_specs=(
            pl.BlockSpec((bt, d, d), lambda b, k: (b, 0, 0)),
            pl.BlockSpec((bt, d, o), lambda b, k: (b, 0, 0)),
            pl.BlockSpec((bt, 1, d), lambda b, k: (b, 0, 0)),
            pl.BlockSpec((bt, 1, o), lambda b, k: (b, 0, 0)),
        ),
        compiler_params=pltpu.CompilerParams(
            dimension_semantics=("parallel", "arbitrary"),
            vmem_limit_bytes=32 * 1024 * 1024,
        ),
    )(X, Y)
    return xtx, xty, xsum, ysum


class RidgeRegressor:
    """JAX/Pallas port of deeptime.layers.RidgeRegressor."""

    def __init__(self, lambda_init: float = 0.0):
        # nn.Parameter(torch.as_tensor(lambda_init, dtype=torch.float))
        self._lambda = jnp.asarray(lambda_init, dtype=jnp.float32)

    def reg_coeff(self):
        return jax.nn.softplus(self._lambda)

    def __call__(self, reprs, x, reg_coeff=None):
        if reg_coeff is None:
            reg_coeff = self.reg_coeff()
        return self.get_weights(reprs, x, reg_coeff)

    def get_weights(self, X, Y, reg_coeff):
        batch, n, d = X.shape
        o = Y.shape[-1]
        reg = jnp.asarray(reg_coeff, jnp.float32)

        if n >= d:
            # Hot path in Pallas: per-batch Gram pieces (no ones-concat, fused
            # accumulation over n_samples tiles).
            xtx, xty, xsum, ysum = ridge_normal_eq_pieces(X, Y)
            d1 = d + 1
            # Assemble A = [[XtX, Xt1], [1tX, N]] + reg*I and B = [[XtY], [1tY]].
            xsum_col = jnp.swapaxes(xsum, -1, -2)                        # (B, d, 1)
            a_top = jnp.concatenate([xtx, xsum_col], axis=-1)            # (B, d, d1)
            n_entry = jnp.full((batch, 1, 1), float(n), jnp.float32)
            a_bot = jnp.concatenate([xsum, n_entry], axis=-1)            # (B, 1, d1)
            A = jnp.concatenate([a_top, a_bot], axis=-2)                 # (B, d1, d1)
            A = A + reg * jnp.eye(d1, dtype=jnp.float32)
            Bmat = jnp.concatenate([xty, ysum], axis=-2)                 # (B, d1, o)
            # A is SPD (Gram + reg*I with softplus reg > 0) -> Cholesky solve,
            # cheaper and better conditioned than batched LU.
            L = jnp.linalg.cholesky(A)
            z = jax.scipy.linalg.solve_triangular(L, Bmat, lower=True)
            weights = jax.scipy.linalg.solve_triangular(
                jnp.swapaxes(L, -1, -2), z, lower=False)
        else:
            # TODO(synk): under-determined branch (n_samples < n_dim) kept in plain
            # JAX; the batched dense linear solve has no clean Pallas equivalent.
            ones = jnp.ones((batch, n, 1), dtype=X.dtype)
            Xa = jnp.concatenate([X, ones], axis=-1)
            A = jnp.einsum('bij,bkj->bik', Xa, Xa) + \
                reg * jnp.eye(n, dtype=X.dtype)
            weights = jnp.einsum('bij,bik->bjk', Xa, jnp.linalg.solve(A, Y))

        weights = weights.astype(X.dtype)
        return weights[:, :-1], weights[:, -1:]


def _reference_get_weights(X, Y, reg_coeff):
    """Pure-JAX reference mirroring the PyTorch code (n_samples >= n_dim path)."""
    batch_size, n_samples, n_dim = X.shape
    ones = jnp.ones((batch_size, n_samples, 1), dtype=X.dtype)
    Xa = jnp.concatenate([X, ones], axis=-1)
    A = jnp.einsum('bji,bjk->bik', Xa, Xa) + reg_coeff * jnp.eye(n_dim + 1, dtype=X.dtype)
    B = jnp.einsum('bji,bjk->bik', Xa, Y)
    weights = jnp.linalg.solve(A, B)
    return weights[:, :-1], weights[:, -1:]


if __name__ == "__main__":
    model = RidgeRegressor(lambda_init=0.0)   # deterministic parameter init
    root = jax.random.PRNGKey(0)

    def _run_case(seed, batch, n, d, o):
        k1, k2 = jax.random.split(jax.random.fold_in(root, seed))
        reprs = jax.random.normal(k1, (batch, n, d), dtype=jnp.float32)
        x = jax.random.normal(k2, (batch, n, o), dtype=jnp.float32)
        w, b = model(reprs, x)
        w, b = jax.block_until_ready(w), jax.block_until_ready(b)
        assert w.shape == (batch, d, o)
        assert b.shape == (batch, 1, o)
        w_ref, b_ref = _reference_get_weights(reprs, x, model.reg_coeff())
        assert jnp.allclose(w, w_ref, atol=1e-4, rtol=1e-4)
        assert jnp.allclose(b, b_ref, atol=1e-4, rtol=1e-4)

    # Case 1: small shapes consistent with the forward (primary check).
    _run_case(seed=1, batch=2, n=16, d=8, o=4)

    # Case 2: n not a multiple of 8 -> exercises the zero-padding path.
    _run_case(seed=2, batch=4, n=20, d=8, o=3)

    # Case 3: multi-step reduction axis (forced small row tile) -> exercises the
    # accumulate-in-output-block path directly.
    k1, k2 = jax.random.split(jax.random.fold_in(root, 3))
    X3 = jax.random.normal(k1, (2, 32, 8), dtype=jnp.float32)
    Y3 = jax.random.normal(k2, (2, 32, 4), dtype=jnp.float32)
    xtx, xty, xsum, ysum = ridge_normal_eq_pieces(X3, Y3, tile_rows=8)
    xtx, xty, xsum, ysum = jax.block_until_ready((xtx, xty, xsum, ysum))
    assert jnp.allclose(xtx, jnp.einsum('bnd,bne->bde', X3, X3), atol=1e-4, rtol=1e-4)
    assert jnp.allclose(xty, jnp.einsum('bnd,bno->bdo', X3, Y3), atol=1e-4, rtol=1e-4)
    assert jnp.allclose(xsum, jnp.sum(X3, axis=1, keepdims=True), atol=1e-4, rtol=1e-4)
    assert jnp.allclose(ysum, jnp.sum(Y3, axis=1, keepdims=True), atol=1e-4, rtol=1e-4)

    print("KERNEL_OK")
</pallas_src>

<mosaic_0001>
module attributes {stable_mosaic.version = 11 : i64} {
  func.func @_normal_eq_kernel(%arg0: i32, %arg1: i32, %arg2: memref<2x16x8xf32, #tpu.memory_space<vmem>>, %arg3: memref<2x16x4xf32, #tpu.memory_space<vmem>>, %arg4: memref<2x8x8xf32, #tpu.memory_space<vmem>>, %arg5: memref<2x8x4xf32, #tpu.memory_space<vmem>>, %arg6: memref<2x1x8xf32, #tpu.memory_space<vmem>>, %arg7: memref<2x1x4xf32, #tpu.memory_space<vmem>>) attributes {dimension_semantics = [#tpu.dimension_semantics<parallel>, #tpu.dimension_semantics<arbitrary>], iteration_bounds = array<i64: 1, 1>, scalar_prefetch = 0 : i64, scratch_operands = 0 : i64, tpu.core_type = #tpu.core_type<tc>, window_params = [{transform_indices = @transform_0, window_bounds = array<i64: 2, 16, 8>}, {transform_indices = @transform_1, window_bounds = array<i64: 2, 16, 4>}, {transform_indices = @transform_2, window_bounds = array<i64: 2, 8, 8>}, {transform_indices = @transform_3, window_bounds = array<i64: 2, 8, 4>}, {transform_indices = @transform_4, window_bounds = array<i64: 2, 1, 8>}, {transform_indices = @transform_5, window_bounds = array<i64: 2, 1, 4>}]} {
    %c0_i32 = arith.constant 0 : i32
    %0 = arith.cmpi eq, %arg1, %c0_i32 : i32
    %1 = arith.extui %0 : i1 to i32
    %c0_i32_0 = arith.constant 0 : i32
    %2 = arith.cmpi ne, %1, %c0_i32_0 : i32
    scf.if %2 {
      %cst_33 = arith.constant 0.000000e+00 : f32
      %23 = vector.broadcast %cst_33 : f32 to vector<2x8x8xf32>
      %c0_34 = arith.constant 0 : index
      %c0_35 = arith.constant 0 : index
      %c0_36 = arith.constant 0 : index
      %24 = vector.load %arg4[%c0_34, %c0_35, %c0_36] : memref<2x8x8xf32, #tpu.memory_space<vmem>>, vector<2x8x8xf32>
      tpu.vector_store %arg4[%c0_34, %c0_35, %c0_36], %23 {strides = array<i32>} : memref<2x8x8xf32, #tpu.memory_space<vmem>>, vector<2x8x8xf32>,
      %cst_37 = arith.constant 0.000000e+00 : f32
      %25 = vector.broadcast %cst_37 : f32 to vector<2x8x4xf32>
      %c0_38 = arith.constant 0 : index
      %c0_39 = arith.constant 0 : index
      %c0_40 = arith.constant 0 : index
      %26 = vector.load %arg5[%c0_38, %c0_39, %c0_40] : memref<2x8x4xf32, #tpu.memory_space<vmem>>, vector<2x8x4xf32>
      tpu.vector_store %arg5[%c0_38, %c0_39, %c0_40], %25 {strides = array<i32>} : memref<2x8x4xf32, #tpu.memory_space<vmem>>, vector<2x8x4xf32>,
      %cst_41 = arith.constant 0.000000e+00 : f32
      %27 = vector.broadcast %cst_41 : f32 to vector<2x1x8xf32>
      %c0_42 = arith.constant 0 : index
      %c0_43 = arith.constant 0 : index
      %c0_44 = arith.constant 0 : index
      %28 = vector.load %arg6[%c0_42, %c0_43, %c0_44] : memref<2x1x8xf32, #tpu.memory_space<vmem>>, vector<2x1x8xf32>
      tpu.vector_store %arg6[%c0_42, %c0_43, %c0_44], %27 {strides = array<i32>} : memref<2x1x8xf32, #tpu.memory_space<vmem>>, vector<2x1x8xf32>,
      %cst_45 = arith.constant 0.000000e+00 : f32
      %29 = vector.broadcast %cst_45 : f32 to vector<2x1x4xf32>
      %c0_46 = arith.constant 0 : index
      %c0_47 = arith.constant 0 : index
      %c0_48 = arith.constant 0 : index
      %30 = vector.load %arg7[%c0_46, %c0_47, %c0_48] : memref<2x1x4xf32, #tpu.memory_space<vmem>>, vector<2x1x4xf32>
      tpu.vector_store %arg7[%c0_46, %c0_47, %c0_48], %29 {strides = array<i32>} : memref<2x1x4xf32, #tpu.memory_space<vmem>>, vector<2x1x4xf32>,
    } else {
    }
    %c0 = arith.constant 0 : index
    %c0_1 = arith.constant 0 : index
    %c0_2 = arith.constant 0 : index
    %3 = vector.load %arg2[%c0, %c0_1, %c0_2] : memref<2x16x8xf32, #tpu.memory_space<vmem>>, vector<2x16x8xf32>
    %c0_3 = arith.constant 0 : index
    %c0_4 = arith.constant 0 : index
    %c0_5 = arith.constant 0 : index
    %4 = vector.load %arg3[%c0_3, %c0_4, %c0_5] : memref<2x16x4xf32, #tpu.memory_space<vmem>>, vector<2x16x4xf32>
    %c0_6 = arith.constant 0 : index
    %c0_7 = arith.constant 0 : index
    %c0_8 = arith.constant 0 : index
    %5 = vector.load %arg4[%c0_6, %c0_7, %c0_8] : memref<2x8x8xf32, #tpu.memory_space<vmem>>, vector<2x8x8xf32>
    "tpu.trace_start"() <{level = 10 : i32, message = "bnd,bne->bde"}> : () -> ()
    %cst = arith.constant dense<0.000000e+00> : vector<2x8x8xf32>
    %6 = tpu.matmul %3, %3, %cst {dimension_numbers = #tpu.dot_dimension_numbers<[1], [1], [2], [2], [0, 0, 0, 2, 1, 2], [0], [0]>} : vector<2x16x8xf32>, vector<2x16x8xf32>, vector<2x8x8xf32> -> vector<2x8x8xf32>
    "tpu.trace_stop"() : () -> ()
    %7 = arith.addf %5, %6 : vector<2x8x8xf32>
    %c0_9 = arith.constant 0 : index
    %c0_10 = arith.constant 0 : index
    %c0_11 = arith.constant 0 : index
    %8 = vector.load %arg4[%c0_9, %c0_10, %c0_11] : memref<2x8x8xf32, #tpu.memory_space<vmem>>, vector<2x8x8xf32>
    tpu.vector_store %arg4[%c0_9, %c0_10, %c0_11], %7 {strides = array<i32>} : memref<2x8x8xf32, #tpu.memory_space<vmem>>, vector<2x8x8xf32>,
    %c0_12 = arith.constant 0 : index
    %c0_13 = arith.constant 0 : index
    %c0_14 = arith.constant 0 : index
    %9 = vector.load %arg5[%c0_12, %c0_13, %c0_14] : memref<2x8x4xf32, #tpu.memory_space<vmem>>, vector<2x8x4xf32>
    "tpu.trace_start"() <{level = 10 : i32, message = "bnd,bno->bdo"}> : () -> ()
    %cst_15 = arith.constant dense<0.000000e+00> : vector<2x8x4xf32>
    %10 = tpu.matmul %3, %4, %cst_15 {dimension_numbers = #tpu.dot_dimension_numbers<[1], [1], [2], [2], [0, 0, 0, 2, 1, 2], [0], [0]>} : vector<2x16x8xf32>, vector<2x16x4xf32>, vector<2x8x4xf32> -> vector<2x8x4xf32>
    "tpu.trace_stop"() : () -> ()
    %11 = arith.addf %9, %10 : vector<2x8x4xf32>
    %c0_16 = arith.constant 0 : index
    %c0_17 = arith.constant 0 : index
    %c0_18 = arith.constant 0 : index
    %12 = vector.load %arg5[%c0_16, %c0_17, %c0_18] : memref<2x8x4xf32, #tpu.memory_space<vmem>>, vector<2x8x4xf32>
    tpu.vector_store %arg5[%c0_16, %c0_17, %c0_18], %11 {strides = array<i32>} : memref<2x8x4xf32, #tpu.memory_space<vmem>>, vector<2x8x4xf32>,
    %c0_19 = arith.constant 0 : index
    %c0_20 = arith.constant 0 : index
    %c0_21 = arith.constant 0 : index
    %13 = vector.load %arg6[%c0_19, %c0_20, %c0_21] : memref<2x1x8xf32, #tpu.memory_space<vmem>>, vector<2x1x8xf32>
    %cst_22 = arith.constant dense<0.000000e+00> : vector<2x8xf32>
    %14 = vector.multi_reduction <add>, %3, %cst_22 [1] : vector<2x16x8xf32> to vector<2x8xf32>
    %15 = vector.shape_cast %14 : vector<2x8xf32> to vector<2x1x8xf32>
    %16 = arith.addf %13, %15 : vector<2x1x8xf32>
    %c0_23 = arith.constant 0 : index
    %c0_24 = arith.constant 0 : index
    %c0_25 = arith.constant 0 : index
    %17 = vector.load %arg6[%c0_23, %c0_24, %c0_25] : memref<2x1x8xf32, #tpu.memory_space<vmem>>, vector<2x1x8xf32>
    tpu.vector_store %arg6[%c0_23, %c0_24, %c0_25], %16 {strides = array<i32>} : memref<2x1x8xf32, #tpu.memory_space<vmem>>, vector<2x1x8xf32>,
    %c0_26 = arith.constant 0 : index
    %c0_27 = arith.constant 0 : index
    %c0_28 = arith.constant 0 : index
    %18 = vector.load %arg7[%c0_26, %c0_27, %c0_28] : memref<2x1x4xf32, #tpu.memory_space<vmem>>, vector<2x1x4xf32>
    %cst_29 = arith.constant dense<0.000000e+00> : vector<2x4xf32>
    %19 = vector.multi_reduction <add>, %4, %cst_29 [1] : vector<2x16x4xf32> to vector<2x4xf32>
    %20 = vector.shape_cast %19 : vector<2x4xf32> to vector<2x1x4xf32>
    %21 = arith.addf %18, %20 : vector<2x1x4xf32>
    %c0_30 = arith.constant 0 : index
    %c0_31 = arith.constant 0 : index
    %c0_32 = arith.constant 0 : index
    %22 = vector.load %arg7[%c0_30, %c0_31, %c0_32] : memref<2x1x4xf32, #tpu.memory_space<vmem>>, vector<2x1x4xf32>
    tpu.vector_store %arg7[%c0_30, %c0_31, %c0_32], %21 {strides = array<i32>} : memref<2x1x4xf32, #tpu.memory_space<vmem>>, vector<2x1x4xf32>,
    return
  }
  func.func @transform_0(%arg0: i32, %arg1: i32) -> (i32, i32, i32) {
    %c0_i32 = arith.constant 0 : i32
    %c0_i32_0 = arith.constant 0 : i32
    return %arg0, %arg1, %c0_i32 : i32, i32, i32
  }
  func.func @transform_1(%arg0: i32, %arg1: i32) -> (i32, i32, i32) {
    %c0_i32 = arith.constant 0 : i32
    %c0_i32_0 = arith.constant 0 : i32
    return %arg0, %arg1, %c0_i32 : i32, i32, i32
  }
  func.func @transform_2(%arg0: i32, %arg1: i32) -> (i32, i32, i32) {
    %c0_i32 = arith.constant 0 : i32
    %c0_i32_0 = arith.constant 0 : i32
    %c0_i32_1 = arith.constant 0 : i32
    return %arg0, %c0_i32, %c0_i32_0 : i32, i32, i32
  }
  func.func @transform_3(%arg0: i32, %arg1: i32) -> (i32, i32, i32) {
    %c0_i32 = arith.constant 0 : i32
    %c0_i32_0 = arith.constant 0 : i32
    %c0_i32_1 = arith.constant 0 : i32
    return %arg0, %c0_i32, %c0_i32_0 : i32, i32, i32
  }
  func.func @transform_4(%arg0: i32, %arg1: i32) -> (i32, i32, i32) {
    %c0_i32 = arith.constant 0 : i32
    %c0_i32_0 = arith.constant 0 : i32
    %c0_i32_1 = arith.constant 0 : i32
    return %arg0, %c0_i32, %c0_i32_0 : i32, i32, i32
  }
  func.func @transform_5(%arg0: i32, %arg1: i32) -> (i32, i32, i32) {
    %c0_i32 = arith.constant 0 : i32
    %c0_i32_0 = arith.constant 0 : i32
    %c0_i32_1 = arith.constant 0 : i32
    return %arg0, %c0_i32, %c0_i32_0 : i32, i32, i32
  }
}

</mosaic_0001>

<bundles_post_ra>
// kernel: tpu_custom_call.1
= control target key start
LH: loop header
LB: loop body
LE: loop exit
PB: predicated region body
PF: predicated region fallthrough
CT: control target
= control target key end

     0   :  { %11 = vsyncpa [#allocation3], 0  ;;  %vm21_vm0 = vcmask 64512   ;;  %v643_v8 = vmov 0.0   ;;  %v644_v11 = vmov 0.0|0.0   ;;  %vm645_vm1 = vmmov 0   ;;  %s801_s0 = inlined_call_operand.vmem [shape: f32[2,16,8], index: 0, kind: input, shape index: {}]   ;;  %s802_s1 = inlined_call_operand.vmem [shape: f32[2,16,4], index: 1, kind: input, shape index: {}]   ;;  %s803_s2 = inlined_call_operand.hbm [shape: f32[2,8,8], index: 2, kind: output, shape index: {0}]   ;;  %s804_s3 = inlined_call_operand.vmem [shape: f32[2,8,4], index: 3, kind: output, shape index: {1}]   ;;  %s805_s4 = inlined_call_operand.hbm [shape: f32[2,1,8], index: 4, kind: output, shape index: {2}]   ;;  %s806_s5 = inlined_call_operand.hbm [shape: f32[2,1,4], index: 5, kind: output, shape index: {3}]  }
   0x1   :  { %v35_v0 = vld [vmem:[%s801_s0 + $0x10] sm:$0xff]  ;;  %v33_v1 = vld [vmem:[%s801_s0] sm:$0xff]  ;;  %v36_v2 = vld [vmem:[%s801_s0 + $0x18] sm:$0xff]  ;;  %22 = vst.msk [vmem:[#allocation2] sm:$0xff] %vm21_vm0, %v643_v8  ;;  %551 = vmatprep.subr.bf16.mxu0 %v644_v11  ;;  %554 = vmatprep.subr.bf16.mxu1 %v644_v11  ;;  %vm24_vm2 = vcmask 31744  }
   0x2   :  { %149 = vxpose.xlu1.b32.start [1/2] (short) (narrow) %v35_v0, 8  ;;  %v417_v3 = vsel %vm21_vm0, %v35_v0, 0.0  ;;  %43 = vxpose.xlu0.b32.start [1/2] (short) (narrow) %v33_v1, 8  ;;  %v408_v4 = vsel %vm21_vm0, %v33_v1, 0.0  ;;  %v418_v5 = vsel %vm21_vm0, %v36_v2, 0.0  ;;  %v34_v6 = vld [vmem:[%s801_s0 + $0x8] sm:$0xff]  ;;  %v555_v7 = vpack.c.bf16 %v36_v2, %v35_v0 }
   0x3   :  { %23 = vst.msk [vmem:[#allocation2 + $0x8] sm:$0xff] %vm21_vm0, %v643_v8  ;;  %v419_v9 = vadd.f32 %v418_v5, %v417_v3  ;;  %v409_v10 = vsel %vm21_vm0, %v34_v6, 0.0  ;;  %v552_v12 = vpack.c.bf16 %v34_v6, %v33_v1  ;;  %527 = vmatprep.mubr.msk.f32.mxu0 %vm645_vm1, %v643_v8  ;;  %v37_v14 = vld [vmem:[%s802_s1] sm:$0xff]  ;;  %v38_v15 = vld [vmem:[%s802_s1 + $0x8] sm:$0xff] }
   0x4   :  { %v410_v13 = vadd.f32 %v409_v10, %v408_v4  ;;  %556 = vmatpush3.bf16.msra.mxu1 %v555_v7 }
   0x5   :  { %12 = vsyncpa [#allocation5], 0  ;;  %553 = vmatpush3.bf16.msra.mxu0 %v552_v12  ;;  %560 = vmatprep.subr.bf16.mxu1 %v644_v11  ;;  %v433_v16 = vsel %vm24_vm2, %v37_v14, 0.0  ;;  %v434_v17 = vsel %vm24_vm2, %v38_v15, 0.0  ;;  %25 = vst.msk [vmem:[%s804_s3] sm:$0xff] %vm24_vm2, %v643_v8  ;;  %v39_v18 = vld [vmem:[%s802_s1 + $0x10] sm:$0xff]  ;;  %v558_v24 = vpack.c.bf16 %v38_v15, %v37_v14 }
   0x6   :  { %26 = vst.msk [vmem:[%s804_s3 + $0x8] sm:$0xff] %vm24_vm2, %v643_v8  ;;  %v40_v19 = vld [vmem:[%s802_s1 + $0x18] sm:$0xff]  ;;  %150 = vxpose.xlu1.b32.end [2/2] (short) (narrow) %v36_v2, 8  ;;  %44 = vxpose.xlu0.b32.end [2/2] (short) (narrow) %v34_v6, 8  ;;  %v435_v20 = vadd.f32 %v434_v17, %v433_v16  ;;  %v442_v21 = vsel %vm24_vm2, %v39_v18, 0.0  ;;  %vm75_vm3 = vcmask 130048  }
   0x7   :  { %v443_v22 = vsel %vm24_vm2, %v40_v19, 0.0  ;;  %534 = vmatprep.mubr.msk.f32.mxu1 %vm645_vm1, %v643_v8  ;;  %557 = vmatprep.subr.bf16.mxu0 %v644_v11  ;;  %v561_v25 = vpack.c.bf16 %v40_v19, %v39_v18  ;;  %v420_v28 = vrot.slane %v419_v9, 4  ;;  %v411_v29 = vrot.slane %v410_v13, 4  ;;  %s646_s1 = smov [#allocation4]  }
   0x8   :  { %v444_v23 = vadd.f32 %v443_v22, %v442_v21  ;;  %v436_v30 = vrot.slane %v435_v20, 4  ;;  %vm27_vm4 = vcmask 57344   ;;  %vm30_vm5 = vcmask 24576   ;;  %s475_s12 = sshll.u32 %s646_s1, 4  ;;  %s476_s12 = int_to_ptr.vmem [resolvable:$true] %s475_s12 }
   0x9   :  { %v421_v32 = vadd.f32 %v420_v28, %v419_v9  ;;  %v412_v33 = vadd.f32 %v411_v29, %v410_v13  ;;  %28 = vst.msk [vmem:[#allocation4] sm:$0x1] %vm27_vm4, %v643_v8  ;;  %29 = vst.msk [vmem:[#allocation4 + $0x1] sm:$0x1] %vm27_vm4, %v643_v8  ;;  %s573_s13 = scalar_lea.vmem %s476_s12, 32  ;;  %p578_p1 = scmp.lt.s32.totalorder %s476_s12, %s476_s12 }
   0xa   :  { %v445_v31 = vrot.slane %v444_v23, 4  ;;  %v437_v34 = vadd.f32 %v436_v30, %v435_v20  ;;  %31 = vst.msk [vmem:[#allocation6] sm:$0x1] %vm30_vm5, %v643_v8  ;;  %32 = vst.msk [vmem:[#allocation6 + $0x1] sm:$0x1] %vm30_vm5, %v643_v8  ;;  %p574_p0 = scmp.ne.s32.totalorder %s476_s12, %s573_s13  ;;  %p579_p2 = scmp.lt.s32.totalorder %s573_s13, %s573_s13 }
   0xb   :  { %v422_v36 = vrot.slane %v421_v32, 2  ;;  %v413_v37 = vrot.slane %v412_v33, 2 }
   0xc   :  { %v446_v35 = vadd.f32 %v445_v31, %v444_v23  ;;  %v438_v38 = vrot.slane %v437_v34, 2  ;;  %p580_p3 = por %p579_p2, %p578_p1 }
   0xd   :  { %v423_v40 = vadd.f32 %v422_v36, %v421_v32  ;;  %v414_v41 = vadd.f32 %v413_v37, %v412_v33 }
   0xe   :  { %v447_v39 = vrot.slane %v446_v35, 2  ;;  %v439_v42 = vadd.f32 %v438_v38, %v437_v34  ;;  %p581_p4 = pnand %p580_p3, %p574_p0 }
   0xf   :  { %v424_v44 = vrot.slane %v423_v40, 1  ;;  %v415_v45 = vrot.slane %v414_v41, 1 }
  0x10   :  { %v448_v43 = vadd.f32 %v447_v39, %v446_v35  ;;  %v440_v46 = vrot.slane %v439_v42, 1  ;;  %v406_v50 = vld [vmem:[#allocation4] sm:$0x1]  ;;  %v407_v51 = vld [vmem:[#allocation4 + $0x1] sm:$0x1] }
  0x11   :  { %v425_v48 = vadd.f32 %v424_v44, %v423_v40  ;;  %v416_v49 = vadd.f32 %v415_v45, %v414_v41  ;;  %v431_v56 = vld [vmem:[#allocation6] sm:$0x1]  ;;  %v432_v57 = vld [vmem:[#allocation6 + $0x1] sm:$0x1] }
  0x12   :  { %v449_v47 = vrot.slane %v448_v43, 1  ;;  %v441_v52 = vadd.f32 %v440_v46, %v439_v42 }
  0x13   :  { %v426_v54 = vadd.f32 %v416_v49, %v406_v50  ;;  %v427_v55 = vadd.f32 %v425_v48, %v407_v51 }
  0x14   :  { %v450_v53 = vadd.f32 %v449_v47, %v448_v43  ;;  %v451_v58 = vadd.f32 %v441_v52, %v431_v56 }
  0x15   :  { %429 = vst.msk [vmem:[#allocation4] sm:$0x1] %vm27_vm4, %v426_v54  ;;  %430 = vst.msk [vmem:[#allocation4 + $0x1] sm:$0x1] %vm27_vm4, %v427_v55 }
  0x16   :  { %v452_v59 = vadd.f32 %v450_v53, %v432_v57  ;;  %454 = vst.msk [vmem:[#allocation6] sm:$0x1] %vm30_vm5, %v451_v58 }
  0x18   :  { %455 = vst.msk [vmem:[#allocation6 + $0x1] sm:$0x1] %vm30_vm5, %v452_v59 }
  0x82   :  { %v165_v26 = vpop.trf.xlu1  ;;  %v59_v27 = vpop.trf.xlu0 }
  0x83   :  { %528 = vmatmul.mubr.msk.f32.vlgmr.msra.gmra.mrb[0].mxu0 %vm75_vm3, %v59_v27  ;;  %535 = vmatmul.mubr.msk.f32.vlgmr.msra.gmra.mrb[0].mxu1 %vm75_vm3, %v165_v26 }
  0x84   :  { %559 = vmatpush3.bf16.msra.mxu0 %v558_v24  ;;  %562 = vmatpush3.bf16.msra.mxu1 %v561_v25 }
  0x85   :  { %541 = vmatprep.mubr.msk.f32.mxu0 %vm645_vm1, %v643_v8  ;;  %548 = vmatprep.mubr.msk.f32.mxu1 %vm645_vm1, %v643_v8 }
  0x87   :  { %542 = vmatmul.mubr.msk.f32.vlgmr.msra.gmra.mrb[2].mxu0 %vm75_vm3, %v59_v27  ;;  %549 = vmatmul.mubr.msk.f32.vlgmr.msra.gmra.mrb[2].mxu1 %vm75_vm3, %v165_v26 }
  0x88   :  { %584 = shalt.err (!%p581_p4)
}
  0x89   :  { %s585_s16 = scalar_lea.hbm %s805_s4, 32 }
  0x8a   :  { %p586_p5 = scmp.ne.s32.totalorder %s805_s4, %s585_s16  ;;  %p589_p6 = scmp.lt.u32.totalorder %s585_s16, %s805_s4 }
  0x8c   :  { %p591_p7 = pnand %p589_p6, %p586_p5 }
  0x8e   :  { %594 = shalt.err (!%p591_p7)
}
  0x8f   :  { %s647_s21 = smov 16   ;;  %s648_s22 = smov 1  }
  0x90   :  { %481 = dma.vmem_to_hbm [thread:$0]  %s476_s12, 32, %s805_s4, [#allocation5], %s647_s21, %s647_s21, %s648_s22  }
  0x91   :  { %s649_s25 = smov [#allocation6]  }
  0x92   :  { %s487_s0 = sshll.u32 %s649_s25, 4  ;;  %s488_s0 = int_to_ptr.vmem [resolvable:$true] %s487_s0 }
  0x93   :  { %s595_s26 = scalar_lea.vmem %s488_s0, 32  ;;  %p600_p9 = scmp.lt.s32.totalorder %s488_s0, %s488_s0 }
  0x94   :  { %p596_p8 = scmp.ne.s32.totalorder %s488_s0, %s595_s26  ;;  %p601_p10 = scmp.lt.s32.totalorder %s595_s26, %s595_s26 }
  0x96   :  { %p602_p11 = por %p601_p10, %p600_p9 }
  0x98   :  { %p603_p12 = pnand %p602_p11, %p596_p8 }
  0x9a   :  { %606 = shalt.err (!%p603_p12)
}
  0x9b   :  { %s607_s29 = scalar_lea.hbm %s806_s5, 32 }
  0x9c   :  { %p608_p13 = scmp.ne.s32.totalorder %s806_s5, %s607_s29  ;;  %p611_p0 = scmp.lt.u32.totalorder %s607_s29, %s806_s5 }
  0x9e   :  { %p613_p1 = pnand %p611_p0, %p608_p13 }
  0xa0   :  { %616 = shalt.err (!%p613_p1)
}
  0xa1   :  { %493 = dma.vmem_to_hbm [thread:$0]  %s488_s0, 32, %s806_s5, [#allocation5], %s647_s21, %s647_s21, %s648_s22   ;;  %v41_v60 = vld [vmem:[#allocation2] sm:$0xff]  ;;  %v42_v61 = vld [vmem:[#allocation2 + $0x8] sm:$0xff] }
  0xa2   :  { %s650_s10 = smov [#allocation2]   ;;  %v259_v4 = vld [vmem:[%s804_s3] sm:$0xff]  ;;  %v260_v5 = vld [vmem:[%s804_s3 + $0x8] sm:$0xff] }
  0xa3   :  { %s461_s11 = sshll.u32 %s650_s10, 4  ;;  %s462_s11 = int_to_ptr.vmem [resolvable:$true] %s461_s11 }
  0xa4   :  { %s617_s5 = scalar_lea.vmem %s462_s11, 256  ;;  %p622_p3 = scmp.lt.s32.totalorder %s462_s11, %s462_s11 }
  0xa5   :  { %p618_p2 = scmp.ne.s32.totalorder %s462_s11, %s617_s5  ;;  %p623_p4 = scmp.lt.s32.totalorder %s617_s5, %s617_s5 }
  0xa7   :  { %p624_p5 = por %p623_p4, %p622_p3 }
  0xa9   :  { %p625_p6 = pnand %p624_p5, %p618_p2 }
 0x156   :  { %v145_v62 = vpop.f32.mrb[0].mxu0  ;;  %v250_v63 = vpop.f32.mrb[0].mxu1 }
 0x157   :  { %v254_v0 = vadd.f32 %v145_v62, %v41_v60  ;;  %v255_v1 = vadd.f32 %v250_v63, %v42_v61  ;;  %v529_v2 = vpop.f32.mrb[1].mxu0  ;;  %v536_v3 = vpop.f32.mrb[1].mxu1 }
 0x159   :  { %257 = vst.msk [vmem:[#allocation2] sm:$0xff] %vm21_vm0, %v254_v0  ;;  %258 = vst.msk [vmem:[#allocation2 + $0x8] sm:$0xff] %vm21_vm0, %v255_v1 }
 0x15a   :  { %v327_v6 = vpop.f32.mrb[2].mxu0  ;;  %v397_v7 = vpop.f32.mrb[2].mxu1 }
 0x15b   :  { %628 = shalt.err (!%p625_p6)
}
 0x15c   :  { %s629_s17 = scalar_lea.hbm %s803_s2, 256 }
 0x15d   :  { %p630_p7 = scmp.ne.s32.totalorder %s803_s2, %s629_s17  ;;  %p633_p8 = scmp.lt.u32.totalorder %s629_s17, %s803_s2 }
 0x15f   :  { %p635_p9 = pnand %p633_p8, %p630_p7 }
 0x161   :  { %638 = shalt.err (!%p635_p9)
}
 0x162   :  { %s651_s22 = smov 128   ;;  %s652_s23 = smov 8   ;;  %v401_v8 = vadd.f32 %v327_v6, %v259_v4  ;;  %v402_v9 = vadd.f32 %v397_v7, %v260_v5  ;;  %v543_v10 = vpop.f32.mrb[3].mxu0  ;;  %v550_v11 = vpop.f32.mrb[3].mxu1 }
 0x163   :  { %467 = dma.vmem_to_hbm [thread:$0]  %s462_s11, 256, %s803_s2, [#allocation3], %s651_s22, %s651_s22, %s652_s23  }
 0x164   :  { %404 = vst.msk [vmem:[%s804_s3] sm:$0xff] %vm24_vm2, %v401_v8  ;;  %405 = vst.msk [vmem:[%s804_s3 + $0x8] sm:$0xff] %vm24_vm2, %v402_v9 }
 0x165   :  { %639 = dma.done.wait [#allocation3], 256  }
 0x166   :  { %640 = vsyncadd [#allocation3], 4294967040 }
 0x167   :  { %641 = dma.done.wait [#allocation5], 64  }
 0x168   :  { %642 = vsyncadd [#allocation5], 4294967232 }
 0x169   :  { %505 = vsyncpa [#allocation3], 1 }
 0x16a   :  { %506 = vsyncpa [#allocation5], 1 }

</bundles_post_ra>
